<compile_context>
chip_gen: v6e
topology: v6e:2x2x1
jax: 0.10.0
libtpu: 0.0.40
codegen_flags: <defaults>
</compile_context>

<pallas_src>
import jax
import jax.numpy as jnp
from jax.experimental import pallas as pl
from jax.experimental.pallas import tpu as pltpu


def _rmsnorm_kernel_factory(eps: float):
    def kernel(x_ref, o_ref):
        # f32 accumulation for mean-of-squares; keep the final multiply in f32
        # as well (better than rounding the per-row scale to bf16 first), then
        # downcast once on the store.
        xf = x_ref[...].astype(jnp.float32)
        ms = jnp.mean(xf * xf, axis=-1, keepdims=True)
        inv = jax.lax.rsqrt(ms + jnp.float32(eps))   # EUP rsqrt
        o_ref[...] = (xf * inv).astype(o_ref.dtype)

    return kernel


def _vmem_budgets():
    """Generation-aware (block_budget_bytes, vmem_limit_bytes, capacity)."""
    capacity = None
    try:
        info = pltpu.get_tpu_info()
        capacity = getattr(info, "vmem_capacity_bytes", None)
    except Exception:
        capacity = None
    if not capacity:
        capacity = 64 * 1024 * 1024  # conservative: assume v7x-sized VMEM
    if capacity >= 128 * 1024 * 1024:
        # v5e / v6e: 128 MiB physical VMEM -> go big.
        return 64 * 1024 * 1024, 96 * 1024 * 1024, capacity
    # v7x: 64 MiB physical per TensorCore -> stay conservative.
    return 24 * 1024 * 1024, 48 * 1024 * 1024, capacity


def _pick_row_tile(rows: int, dim: int, dtype):
    """Largest sublane-aligned row tile fitting the VMEM budget.

    Returns (row_tile, vmem_limit_bytes).
    """
    itemsize = jnp.dtype(dtype).itemsize
    # Sublane packing: 8 for f32, 16 for bf16, 32 for int8/fp8.
    pack = max(8, 32 // max(1, itemsize))
    block_budget, vmem_limit, capacity = _vmem_budgets()

    # Live VMEM bytes per element across the pipeline:
    #   input double-buffer (2*itemsize) + output double-buffer (2*itemsize)
    #   + one block-sized f32 temp for the upcast/square when input < 32-bit.
    live_bytes_per_elem = 4 * itemsize + (4 if itemsize < 4 else 0)
    bytes_per_row = dim * live_bytes_per_elem

    rows_by_vmem = block_budget // bytes_per_row
    if rows_by_vmem < pack:
        # Huge dim: forced to the minimum packed tile; raise the scoped VMEM
        # limit so it still compiles (bounded by physical capacity - margin).
        # TODO(synk): for dim so large that even `pack` rows don't fit in
        # VMEM, split into a two-pass (sum-of-squares, then scale) kernel.
        tile = pack
        needed = tile * bytes_per_row + (8 << 20)
        vmem_limit = max(vmem_limit, min(needed, capacity - (8 << 20)))
    else:
        tile = min(4096, int(rows_by_vmem))
        tile = max(pack, (tile // pack) * pack)

    needed_rows = ((rows + pack - 1) // pack) * pack
    tile = min(tile, needed_rows)
    return tile, vmem_limit


def rmsnorm_pallas(x: jax.Array, eps: float, *, row_tile: int | None = None) -> jax.Array:
    """x: (..., dim). Returns x / sqrt(mean(x^2, -1, keepdims) + eps)."""
    orig_shape = x.shape
    dim = orig_shape[-1]
    rows = 1
    for s in orig_shape[:-1]:
        rows *= s
    x2d = x.reshape(rows, dim)

    if row_tile is None:
        row_tile, vmem_limit = _pick_row_tile(rows, dim, x.dtype)
    else:
        _, vmem_limit = _pick_row_tile(rows, dim, x.dtype)

    grid = (pl.cdiv(rows, row_tile),)
    itemsize = jnp.dtype(x.dtype).itemsize

    out = pl.pallas_call(
        _rmsnorm_kernel_factory(eps),
        out_shape=jax.ShapeDtypeStruct((rows, dim), x.dtype),
        grid_spec=pltpu.PrefetchScalarGridSpec(
            num_scalar_prefetch=0,
            grid=grid,
            in_specs=[pl.BlockSpec((row_tile, dim), lambda i: (i, 0))],
            out_specs=pl.BlockSpec((row_tile, dim), lambda i: (i, 0)),
        ),
        # Output is identical shape/dtype to the input: reuse the HBM buffer.
        input_output_aliases={0: 0},
        cost_estimate=pl.CostEstimate(
            flops=3 * rows * dim,
            transcendentals=rows,
            bytes_accessed=2 * rows * dim * itemsize,
        ),
        compiler_params=pltpu.CompilerParams(
            # "parallel" lets v7x shard the row loop across its 2 TensorCores
            # (near-zero effect on single-TC v5e/v6e).
            dimension_semantics=("parallel",),
            vmem_limit_bytes=int(vmem_limit),
        ),
    )(x2d)

    return out.reshape(orig_shape)


if __name__ == "__main__":
    # Config-implied small shapes: batch=2, seq=8, dim_size(hidden)=32
    batch, seq, dim_size = 2, 8, 32
    eps = 1e-6  # config.rps_norm_eps

    key = jax.random.PRNGKey(0)
    x = jax.random.normal(key, (batch, seq, dim_size), dtype=jnp.float32)

    # Module parameters (unused by forward(); kept for shape fidelity).
    scale = jnp.ones((dim_size,), dtype=jnp.float32)
    shift = jnp.zeros((dim_size,), dtype=jnp.float32)

    # jit the wrapper so the in-call input/output aliasing is managed by XLA
    # (it inserts a copy only if the caller still needs x).
    rmsnorm = jax.jit(lambda a: rmsnorm_pallas(a, eps))
    out = rmsnorm(x)
    out = jax.block_until_ready(out)

    # Reference check in plain JAX.
    ref = x / jnp.sqrt(jnp.mean(x * x, axis=-1, keepdims=True) + eps)
    assert jnp.allclose(out, ref, atol=1e-5, rtol=1e-5), "mismatch vs reference"

    print("KERNEL_OK")
</pallas_src>

<mosaic_0001>
module attributes {stable_mosaic.version = 11 : i64} {
  func.func @kernel(%arg0: i32, %arg1: memref<16x32xf32, #tpu.memory_space<vmem>>, %arg2: memref<16x32xf32, #tpu.memory_space<vmem>>) attributes {dimension_semantics = [#tpu.dimension_semantics<parallel>], iteration_bounds = array<i64: 1>, scalar_prefetch = 0 : i64, scratch_operands = 0 : i64, tpu.core_type = #tpu.core_type<tc>, window_params = [{transform_indices = @transform_0, window_bounds = array<i64: 16, 32>}, {transform_indices = @transform_1, window_bounds = array<i64: 16, 32>}]} {
    %c0 = arith.constant 0 : index
    %c0_0 = arith.constant 0 : index
    %0 = vector.load %arg1[%c0, %c0_0] : memref<16x32xf32, #tpu.memory_space<vmem>>, vector<16x32xf32>
    %1 = arith.mulf %0, %0 : vector<16x32xf32>
    %cst = arith.constant dense<0.000000e+00> : vector<16xf32>
    %2 = vector.multi_reduction <add>, %1, %cst [1] : vector<16x32xf32> to vector<16xf32>
    %3 = vector.shape_cast %2 : vector<16xf32> to vector<16x1xf32>
    %cst_1 = arith.constant 3.200000e+01 : f32
    %4 = vector.broadcast %cst_1 : f32 to vector<16x1xf32>
    %5 = arith.divf %3, %4 : vector<16x1xf32>
    %cst_2 = arith.constant 9.99999997E-7 : f32
    %6 = vector.broadcast %cst_2 : f32 to vector<16x1xf32>
    %7 = arith.addf %5, %6 : vector<16x1xf32>
    %8 = math.rsqrt %7 : vector<16x1xf32>
    %9 = vector.broadcast %8 : vector<16x1xf32> to vector<16x32xf32>
    %10 = arith.mulf %0, %9 : vector<16x32xf32>
    %c0_3 = arith.constant 0 : index
    %c0_4 = arith.constant 0 : index
    %11 = vector.load %arg2[%c0_3, %c0_4] : memref<16x32xf32, #tpu.memory_space<vmem>>, vector<16x32xf32>
    tpu.vector_store %arg2[%c0_3, %c0_4], %10 {strides = array<i32>} : memref<16x32xf32, #tpu.memory_space<vmem>>, vector<16x32xf32>,
    return
  }
  func.func @transform_0(%arg0: i32) -> (i32, i32) {
    %c0_i32 = arith.constant 0 : i32
    %c0_i32_0 = arith.constant 0 : i32
    return %arg0, %c0_i32 : i32, i32
  }
  func.func @transform_1(%arg0: i32) -> (i32, i32) {
    %c0_i32 = arith.constant 0 : i32
    %c0_i32_0 = arith.constant 0 : i32
    return %arg0, %c0_i32 : i32, i32
  }
}

</mosaic_0001>

<bundles_post_ra>
// kernel: _lambda_.1
= control target key start
LH: loop header
LB: loop body
LE: loop exit
PB: predicated region body
PF: predicated region fallthrough
CT: control target
= control target key end

     0   :  { %vm12_vm0 = vcmask 261120   ;;  %s64_s0 = inlined_call_operand.vmem [shape: f32[16,32], index: 0, kind: input, shape index: {}, may-alias: {0,1}]   ;;  %s65_s1 = inlined_call_operand.vmem [shape: f32[16,32], index: 1, kind: output, shape index: {}, may-alias: {0,1}]  }
   0x1   :  { %v8_v0 = vld [vmem:[%s64_s0] sm:$0xff]  ;;  %v9_v1 = vld [vmem:[%s64_s0 + $0x8] sm:$0xff] }
   0x2   :  { %v10_v2 = vmul.f32 %v8_v0, %v8_v0  ;;  %v11_v3 = vmul.f32 %v9_v1, %v9_v1 }
   0x4   :  { %v13_v4 = vsel %vm12_vm0, %v10_v2, 0.0  ;;  %v16_v5 = vsel %vm12_vm0, %v11_v3, 0.0 }
   0x5   :  { %14 = vadd.xlane.f32.xlu0 %v13_v4 }
   0x9   :  { %17 = vadd.xlane.f32.xlu0 %v16_v5 }
  0x8e   :  { %v15_v6 = vpop.xlane.xlu0 %14 }
  0x8f   :  { %v20_v7 = vmul.f32 0.03125, %v15_v6 }
  0x91   :  { %v22_v8 = vadd.f32 1e-06, %v20_v7 }
  0x92   :  { %v18_v9 = vpop.xlane.xlu0 %17 }
  0x93   :  { %34 = vrsqrt.f32 %v22_v8  ;;  %v21_v10 = vmul.f32 0.03125, %v18_v9 }
  0x95   :  { %v23_v11 = vadd.f32 1e-06, %v21_v10 }
  0x97   :  { %36 = vrsqrt.f32 %v23_v11 }
  0xa0   :  { %v35_v12 = vpop.eup %34 }
  0xa1   :  { %v26_v13 = vmul.f32 %v35_v12, %v8_v0 }
  0xa3   :  { %28 = vst.msk [vmem:[%s65_s1] sm:$0xff] %vm12_vm0, %v26_v13 }
  0xa4   :  { %v37_v14 = vpop.eup %36 }
  0xa5   :  { %v27_v15 = vmul.f32 %v37_v14, %v9_v1 }
  0xa7   :  { %29 = vst.msk [vmem:[%s65_s1 + $0x8] sm:$0xff] %vm12_vm0, %v27_v15 }

</bundles_post_ra>
